<compile_context>
chip_gen: v7x
topology: tpu7x:2x2x1
jax: 0.10.0
libtpu: 0.0.40
codegen_flags: <defaults>
</compile_context>

<pallas_src>
import jax
import jax.numpy as jnp
from jax.experimental import pallas as pl
from jax.experimental.pallas import tpu as pltpu

LN_EPS = 1e-5


def _round_up(x, m):
    return ((x + m - 1) // m) * m


def _vmem_capacity_bytes():
    """Physical per-core VMEM (128 MiB v5e/v6e, 64 MiB v7x); safe fallback."""
    try:
        cap = getattr(pltpu.get_tpu_info(), "vmem_capacity_bytes", None)
        if cap:
            return int(cap)
    except Exception:
        pass
    return 64 * 1024 * 1024


def _est_vmem(tm, tv, H, x_bytes, out_bytes):
    """Per-step VMEM estimate for the chosen tiling (double-buffered streaming
    operands, single-buffered constants, bf16 h scratch)."""
    return (2 * tm * H * x_bytes        # x row tile (native dtype)
            + H * H * 2                 # dense W1 (bf16, single-buffered)
            + 3 * H * 4                 # b1 / gamma / beta (f32, single-buffered)
            + 2 * H * tv * 2            # decoder W2 tile (bf16)
            + 2 * tv * 4                # decoder bias tile
            + 2 * tm * tv * out_bytes   # output tile
            + tm * H * 2)               # h scratch (bf16)


# --------------------------------------------------------------------------
# Kernel
# --------------------------------------------------------------------------
def _lm_head_kernel(x_ref, w1_ref, b1_ref, gamma_ref, beta_ref,
                    w2_ref, b2_ref, o_ref, h_scratch):
    """Grid = (row_tiles, vocab_tiles).

    NOTE: the h_scratch reuse below is only correct because the vocab axis is
    the innermost grid axis and marked "arbitrary" (sequential).  Do not
    reorder the grid axes or mark axis 1 as parallel.
    """
    j = pl.program_id(1)

    @pl.when(j == 0)
    def _():
        # dense: bf16 x @ bf16 W1 -> f32 accumulate (MXU-native on all chips)
        x = x_ref[...].astype(jnp.bfloat16)
        h = jnp.dot(x, w1_ref[...], preferred_element_type=jnp.float32)
        h = h + b1_ref[...]                                   # (tm,H)+(1,H)
        # exact erf GELU (f32 on VPU/EUP; this block is off the vocab loop)
        h = 0.5 * h * (1.0 + jax.lax.erf(h * (1.0 / jnp.sqrt(2.0))))
        # LayerNorm over hidden axis, biased variance, eps=1e-5 (f32)
        mean = jnp.mean(h, axis=-1, keepdims=True)
        centered = h - mean
        var = jnp.mean(centered * centered, axis=-1, keepdims=True)
        inv = jax.lax.rsqrt(var + LN_EPS)
        h = centered * inv * gamma_ref[...] + beta_ref[...]
        h_scratch[...] = h.astype(h_scratch.dtype)            # bf16 scratch

    # decoder: bf16 h @ bf16 W2_tile -> f32 accumulate, + bias
    out = jnp.dot(h_scratch[...], w2_ref[...],
                  preferred_element_type=jnp.float32)
    o_ref[...] = (out + b2_ref[...]).astype(o_ref.dtype)


# --------------------------------------------------------------------------
# One-time parameter preparation (outside the forward/hot path)
# --------------------------------------------------------------------------
def prepare_params(params, *, tv=1024):
    """Pre-cast weights to bf16 and pre-pad the vocab axis to a multiple of
    the vocab tile `tv` (power-of-two multiple of 128).  Call once; reuse the
    result for every forward call so no per-call cast/pad HBM traffic."""
    assert tv % 128 == 0 and ((tv // 128) & ((tv // 128) - 1)) == 0, \
        "tv must be a power-of-two multiple of 128"
    H, V = params["decoder_w"].shape
    Vp = _round_up(V, tv)
    w2 = params["decoder_w"].astype(jnp.bfloat16)
    b2 = params["decoder_b"].astype(jnp.float32).reshape(1, V)
    if Vp != V:
        w2 = jnp.pad(w2, ((0, 0), (0, Vp - V)))
        b2 = jnp.pad(b2, ((0, 0), (0, Vp - V)))
    return {
        "dense_w": params["dense_w"].astype(jnp.bfloat16),      # [H,H] (in,out)
        "dense_b": params["dense_b"].astype(jnp.float32).reshape(1, H),
        "ln_gamma": params["ln_gamma"].astype(jnp.float32).reshape(1, H),
        "ln_beta": params["ln_beta"].astype(jnp.float32).reshape(1, H),
        "decoder_w": w2,                                        # [H,Vp] bf16
        "decoder_b": b2,                                        # [1,Vp] f32
        "vocab_size": V,
        "tv": tv,
    }


# --------------------------------------------------------------------------
# Forward wrapper
# --------------------------------------------------------------------------
def bert_lm_prediction_head(hidden_states, prepared, *, tm=None, out_dtype=None):
    """hidden_states: [B, S, H] -> logits [B, S, V].

    out_dtype=None keeps the input dtype; pass jnp.bfloat16 to halve the
    (dominant) N x V output writeback if bf16 logits are acceptable.
    """
    B, S, H = hidden_states.shape
    N = B * S
    V = prepared["vocab_size"]
    tv = prepared["tv"]
    Vp = prepared["decoder_w"].shape[1]
    out_dtype = hidden_states.dtype if out_dtype is None else out_dtype

    x2d = hidden_states.reshape(N, H)            # native dtype; bf16 cast in-kernel
    x_bytes = x2d.dtype.itemsize
    out_bytes = jnp.dtype(out_dtype).itemsize

    # ---------------- VMEM budget (per-generation) ----------------
    vmem_cap = _vmem_capacity_bytes()            # 128 MiB v5e/v6e, 64 MiB v7x
    budget = int(vmem_cap * 0.75)                # headroom for compiler scratch

    # ---------------- row tiling ----------------
    N8 = _round_up(N, 8)
    if tm is None:
        tm = N8
        # Megacore (v7x): give both TensorCores at least one tile on the
        # (only) "parallel" axis once N is large enough to matter.
        if N8 >= 2048:
            tm = _round_up((N8 + 1) // 2, 8)
    tm = min(_round_up(max(tm, 8), 8), N8)
    # Shrink tm until the full per-step estimate (incl. output buffers) fits.
    while tm > 8 and _est_vmem(tm, tv, H, x_bytes, out_bytes) > budget:
        tm = _round_up(max(tm // 2, 8), 8)
    # TODO(synk): also shrink tv (keeping tv | Vp) if tm=8 still overflows at
    # extreme H; not needed for realistic BERT-head shapes.

    Np = _round_up(N8, tm)
    if Np != N:
        x2d = jnp.pad(x2d, ((0, Np - N), (0, 0)))

    est = _est_vmem(tm, tv, H, x_bytes, out_bytes)
    vmem_limit = int(min(budget, max(2 * est, 16 * 1024 * 1024)))
    vmem_limit = max(vmem_limit, est + (2 << 20))

    grid = (Np // tm, Vp // tv)
    const = pl.Buffered(1)   # single-buffer constant-index operands

    out2d = pl.pallas_call(
        _lm_head_kernel,
        out_shape=jax.ShapeDtypeStruct((Np, Vp), out_dtype),
        grid_spec=pltpu.PrefetchScalarGridSpec(
            num_scalar_prefetch=0,
            grid=grid,
            in_specs=[
                pl.BlockSpec((tm, H), lambda i, j: (i, 0)),                      # x rows
                pl.BlockSpec((H, H), lambda i, j: (0, 0), pipeline_mode=const),  # W1 (bf16)
                pl.BlockSpec((1, H), lambda i, j: (0, 0), pipeline_mode=const),  # b1
                pl.BlockSpec((1, H), lambda i, j: (0, 0), pipeline_mode=const),  # gamma
                pl.BlockSpec((1, H), lambda i, j: (0, 0), pipeline_mode=const),  # beta
                pl.BlockSpec((H, tv), lambda i, j: (0, j)),                      # W2 tile (bf16)
                pl.BlockSpec((1, tv), lambda i, j: (0, j)),                      # decoder b tile
            ],
            out_specs=pl.BlockSpec((tm, tv), lambda i, j: (i, j)),
            scratch_shapes=[pltpu.VMEM((tm, H), jnp.bfloat16)],
        ),
        compiler_params=pltpu.CompilerParams(
            dimension_semantics=("parallel", "arbitrary"),
            vmem_limit_bytes=vmem_limit),
    )(
        x2d,
        prepared["dense_w"], prepared["dense_b"],
        prepared["ln_gamma"], prepared["ln_beta"],
        prepared["decoder_w"], prepared["decoder_b"],
    )
    return out2d[:N, :V].reshape(B, S, V)


# --------------------------------------------------------------------------
# Test harness
# --------------------------------------------------------------------------
def init_params(key, hidden_size, vocab_size):
    k1, k2, k3, k4 = jax.random.split(key, 4)
    scale = 0.02
    return {
        # stored [in, out] (transpose of PyTorch nn.Linear.weight)
        "dense_w": scale * jax.random.normal(k1, (hidden_size, hidden_size), jnp.float32),
        "dense_b": scale * jax.random.normal(k2, (1, hidden_size), jnp.float32),
        "ln_gamma": jnp.ones((1, hidden_size), jnp.float32),
        "ln_beta": jnp.zeros((1, hidden_size), jnp.float32),
        "decoder_w": scale * jax.random.normal(k3, (hidden_size, vocab_size), jnp.float32),
        # non-zero bias so the test exercises the bias-add path
        "decoder_b": scale * jax.random.normal(k4, (1, vocab_size), jnp.float32),
    }


def _reference(hidden_states, p):
    """Pure-JAX reference mirroring the kernel's bf16 MXU paths."""
    x = hidden_states.astype(jnp.bfloat16)
    w1 = p["dense_w"].astype(jnp.bfloat16)
    h = jnp.dot(x, w1, preferred_element_type=jnp.float32) + p["dense_b"].reshape(-1)
    h = 0.5 * h * (1.0 + jax.lax.erf(h / jnp.sqrt(2.0)))
    mean = jnp.mean(h, axis=-1, keepdims=True)
    var = jnp.mean((h - mean) ** 2, axis=-1, keepdims=True)
    h = (h - mean) * jax.lax.rsqrt(var + LN_EPS) * p["ln_gamma"].reshape(-1) \
        + p["ln_beta"].reshape(-1)
    h16 = h.astype(jnp.bfloat16)
    w16 = p["decoder_w"].astype(jnp.bfloat16)
    return jnp.dot(h16, w16, preferred_element_type=jnp.float32) + p["decoder_b"].reshape(-1)


if __name__ == "__main__":
    # Small shapes; V not a multiple of 128 and S chosen so N needs row padding,
    # to exercise the padding/slicing path and multiple vocab tiles.
    B, S, H, V = 2, 7, 128, 1250
    key = jax.random.PRNGKey(0)
    kx, kp = jax.random.split(key)
    hidden_states = jax.random.normal(kx, (B, S, H), jnp.float32)
    params = init_params(kp, H, V)

    prepared = prepare_params(params, tv=512)   # one-time cast/pad (off hot path)

    out = bert_lm_prediction_head(hidden_states, prepared)
    out = jax.block_until_ready(out)

    ref = _reference(hidden_states, params)
    assert out.shape == (B, S, V)
    assert jnp.allclose(out, ref, atol=2e-2, rtol=2e-2), (
        "mismatch vs reference, max abs err = "
        f"{float(jnp.max(jnp.abs(out - ref)))}")
    print("KERNEL_OK")
</pallas_src>

<mosaic_0001>
module attributes {stable_mosaic.version = 11 : i64} {
  func.func @_lm_head_kernel(%arg0: i32, %arg1: i32, %arg2: memref<16x128xf32, #tpu.memory_space<vmem>>, %arg3: memref<128x128xbf16, #tpu.memory_space<vmem>>, %arg4: memref<1x128xf32, #tpu.memory_space<vmem>>, %arg5: memref<1x128xf32, #tpu.memory_space<vmem>>, %arg6: memref<1x128xf32, #tpu.memory_space<vmem>>, %arg7: memref<128x512xbf16, #tpu.memory_space<vmem>>, %arg8: memref<1x512xf32, #tpu.memory_space<vmem>>, %arg9: memref<16x512xf32, #tpu.memory_space<vmem>>, %arg10: memref<16x128xbf16, #tpu.memory_space<vmem>>) attributes {dimension_semantics = [#tpu.dimension_semantics<parallel>, #tpu.dimension_semantics<arbitrary>], iteration_bounds = array<i64: 1, 3>, scalar_prefetch = 0 : i64, scratch_operands = 1 : i64, tpu.core_type = #tpu.core_type<tc>, window_params = [{transform_indices = @transform_0, window_bounds = array<i64: 16, 128>}, {pipeline_mode = #tpu.pipeline_mode<synchronous>, transform_indices = @transform_1, window_bounds = array<i64: 128, 128>}, {pipeline_mode = #tpu.pipeline_mode<synchronous>, transform_indices = @transform_2, window_bounds = array<i64: 1, 128>}, {pipeline_mode = #tpu.pipeline_mode<synchronous>, transform_indices = @transform_3, window_bounds = array<i64: 1, 128>}, {pipeline_mode = #tpu.pipeline_mode<synchronous>, transform_indices = @transform_4, window_bounds = array<i64: 1, 128>}, {transform_indices = @transform_5, window_bounds = array<i64: 128, 512>}, {transform_indices = @transform_6, window_bounds = array<i64: 1, 512>}, {transform_indices = @transform_7, window_bounds = array<i64: 16, 512>}]} {
    %c0_i32 = arith.constant 0 : i32
    %0 = arith.cmpi eq, %arg1, %c0_i32 : i32
    %1 = arith.extui %0 : i1 to i32
    %c0_i32_0 = arith.constant 0 : i32
    %2 = arith.cmpi ne, %1, %c0_i32_0 : i32
    scf.if %2 {
      %c0_8 = arith.constant 0 : index
      %c0_9 = arith.constant 0 : index
      %10 = vector.load %arg2[%c0_8, %c0_9] : memref<16x128xf32, #tpu.memory_space<vmem>>, vector<16x128xf32>
      %11 = arith.truncf %10 : vector<16x128xf32> to vector<16x128xbf16>
      %c0_10 = arith.constant 0 : index
      %c0_11 = arith.constant 0 : index
      %12 = vector.load %arg3[%c0_10, %c0_11] : memref<128x128xbf16, #tpu.memory_space<vmem>>, vector<128x128xbf16>
      %cst_12 = arith.constant dense<0.000000e+00> : vector<16x128xf32>
      %13 = tpu.matmul %11, %12, %cst_12 {dimension_numbers = #tpu.dot_dimension_numbers<[1], [0], [0], [1], [0, 0, 1, 1], [], []>} : vector<16x128xbf16>, vector<128x128xbf16>, vector<16x128xf32> -> vector<16x128xf32>
      %c0_13 = arith.constant 0 : index
      %c0_14 = arith.constant 0 : index
      %14 = vector.load %arg4[%c0_13, %c0_14] : memref<1x128xf32, #tpu.memory_space<vmem>>, vector<1x128xf32>
      %15 = vector.broadcast %14 : vector<1x128xf32> to vector<16x128xf32>
      %16 = arith.addf %13, %15 : vector<16x128xf32>
      %cst_15 = arith.constant 5.000000e-01 : f32
      %17 = vector.broadcast %cst_15 : f32 to vector<16x128xf32>
      %18 = arith.mulf %17, %16 : vector<16x128xf32>
      %cst_16 = arith.constant 2.000000e+00 : f32
      %19 = math.sqrt %cst_16 : f32
      %cst_17 = arith.constant 1.000000e+00 : f32
      %20 = arith.divf %cst_17, %19 : f32
      %21 = vector.broadcast %20 : f32 to vector<16x128xf32>
      %22 = arith.mulf %16, %21 : vector<16x128xf32>
      %23 = math.erf %22 : vector<16x128xf32>
      %cst_18 = arith.constant 1.000000e+00 : f32
      %24 = vector.broadcast %cst_18 : f32 to vector<16x128xf32>
      %25 = arith.addf %24, %23 : vector<16x128xf32>
      %26 = arith.mulf %18, %25 : vector<16x128xf32>
      %cst_19 = arith.constant dense<0.000000e+00> : vector<16xf32>
      %27 = vector.multi_reduction <add>, %26, %cst_19 [1] : vector<16x128xf32> to vector<16xf32>
      %28 = vector.shape_cast %27 : vector<16xf32> to vector<16x1xf32>
      %cst_20 = arith.constant 1.280000e+02 : f32
      %29 = vector.broadcast %cst_20 : f32 to vector<16x1xf32>
      %30 = arith.divf %28, %29 : vector<16x1xf32>
      %31 = vector.broadcast %30 : vector<16x1xf32> to vector<16x128xf32>
      %32 = arith.subf %26, %31 : vector<16x128xf32>
      %33 = arith.mulf %32, %32 : vector<16x128xf32>
      %cst_21 = arith.constant dense<0.000000e+00> : vector<16xf32>
      %34 = vector.multi_reduction <add>, %33, %cst_21 [1] : vector<16x128xf32> to vector<16xf32>
      %35 = vector.shape_cast %34 : vector<16xf32> to vector<16x1xf32>
      %cst_22 = arith.constant 1.280000e+02 : f32
      %36 = vector.broadcast %cst_22 : f32 to vector<16x1xf32>
      %37 = arith.divf %35, %36 : vector<16x1xf32>
      %cst_23 = arith.constant 9.99999974E-6 : f32
      %38 = vector.broadcast %cst_23 : f32 to vector<16x1xf32>
      %39 = arith.addf %37, %38 : vector<16x1xf32>
      %40 = math.rsqrt %39 : vector<16x1xf32>
      %41 = vector.broadcast %40 : vector<16x1xf32> to vector<16x128xf32>
      %42 = arith.mulf %32, %41 : vector<16x128xf32>
      %c0_24 = arith.constant 0 : index
      %c0_25 = arith.constant 0 : index
      %43 = vector.load %arg5[%c0_24, %c0_25] : memref<1x128xf32, #tpu.memory_space<vmem>>, vector<1x128xf32>
      %44 = vector.broadcast %43 : vector<1x128xf32> to vector<16x128xf32>
      %45 = arith.mulf %42, %44 : vector<16x128xf32>
      %c0_26 = arith.constant 0 : index
      %c0_27 = arith.constant 0 : index
      %46 = vector.load %arg6[%c0_26, %c0_27] : memref<1x128xf32, #tpu.memory_space<vmem>>, vector<1x128xf32>
      %47 = vector.broadcast %46 : vector<1x128xf32> to vector<16x128xf32>
      %48 = arith.addf %45, %47 : vector<16x128xf32>
      %49 = arith.truncf %48 : vector<16x128xf32> to vector<16x128xbf16>
      %c0_28 = arith.constant 0 : index
      %c0_29 = arith.constant 0 : index
      %50 = vector.load %arg10[%c0_28, %c0_29] : memref<16x128xbf16, #tpu.memory_space<vmem>>, vector<16x128xbf16>
      tpu.vector_store %arg10[%c0_28, %c0_29], %49 {strides = array<i32>} : memref<16x128xbf16, #tpu.memory_space<vmem>>, vector<16x128xbf16>,
    } else {
    }
    %c0 = arith.constant 0 : index
    %c0_1 = arith.constant 0 : index
    %3 = vector.load %arg10[%c0, %c0_1] : memref<16x128xbf16, #tpu.memory_space<vmem>>, vector<16x128xbf16>
    %c0_2 = arith.constant 0 : index
    %c0_3 = arith.constant 0 : index
    %4 = vector.load %arg7[%c0_2, %c0_3] : memref<128x512xbf16, #tpu.memory_space<vmem>>, vector<128x512xbf16>
    %cst = arith.constant dense<0.000000e+00> : vector<16x512xf32>
    %5 = tpu.matmul %3, %4, %cst {dimension_numbers = #tpu.dot_dimension_numbers<[1], [0], [0], [1], [0, 0, 1, 1], [], []>} : vector<16x128xbf16>, vector<128x512xbf16>, vector<16x512xf32> -> vector<16x512xf32>
    %c0_4 = arith.constant 0 : index
    %c0_5 = arith.constant 0 : index
    %6 = vector.load %arg8[%c0_4, %c0_5] : memref<1x512xf32, #tpu.memory_space<vmem>>, vector<1x512xf32>
    %7 = vector.broadcast %6 : vector<1x512xf32> to vector<16x512xf32>
    %8 = arith.addf %5, %7 : vector<16x512xf32>
    %c0_6 = arith.constant 0 : index
    %c0_7 = arith.constant 0 : index
    %9 = vector.load %arg9[%c0_6, %c0_7] : memref<16x512xf32, #tpu.memory_space<vmem>>, vector<16x512xf32>
    tpu.vector_store %arg9[%c0_6, %c0_7], %8 {strides = array<i32>} : memref<16x512xf32, #tpu.memory_space<vmem>>, vector<16x512xf32>,
    return
  }
  func.func @transform_0(%arg0: i32, %arg1: i32) -> (i32, i32) {
    %c0_i32 = arith.constant 0 : i32
    %c0_i32_0 = arith.constant 0 : i32
    return %arg0, %c0_i32 : i32, i32
  }
  func.func @transform_1(%arg0: i32, %arg1: i32) -> (i32, i32) {
    %c0_i32 = arith.constant 0 : i32
    %c0_i32_0 = arith.constant 0 : i32
    %c0_i32_1 = arith.constant 0 : i32
    return %c0_i32, %c0_i32_0 : i32, i32
  }
  func.func @transform_2(%arg0: i32, %arg1: i32) -> (i32, i32) {
    %c0_i32 = arith.constant 0 : i32
    %c0_i32_0 = arith.constant 0 : i32
    %c0_i32_1 = arith.constant 0 : i32
    return %c0_i32, %c0_i32_0 : i32, i32
  }
  func.func @transform_3(%arg0: i32, %arg1: i32) -> (i32, i32) {
    %c0_i32 = arith.constant 0 : i32
    %c0_i32_0 = arith.constant 0 : i32
    %c0_i32_1 = arith.constant 0 : i32
    return %c0_i32, %c0_i32_0 : i32, i32
  }
  func.func @transform_4(%arg0: i32, %arg1: i32) -> (i32, i32) {
    %c0_i32 = arith.constant 0 : i32
    %c0_i32_0 = arith.constant 0 : i32
    %c0_i32_1 = arith.constant 0 : i32
    return %c0_i32, %c0_i32_0 : i32, i32
  }
  func.func @transform_5(%arg0: i32, %arg1: i32) -> (i32, i32) {
    %c0_i32 = arith.constant 0 : i32
    %c0_i32_0 = arith.constant 0 : i32
    return %c0_i32, %arg1 : i32, i32
  }
  func.func @transform_6(%arg0: i32, %arg1: i32) -> (i32, i32) {
    %c0_i32 = arith.constant 0 : i32
    %c0_i32_0 = arith.constant 0 : i32
    return %c0_i32, %arg1 : i32, i32
  }
  func.func @transform_7(%arg0: i32, %arg1: i32) -> (i32, i32) {
    %c0_i32 = arith.constant 0 : i32
    return %arg0, %arg1 : i32, i32
  }
}

</mosaic_0001>

<bundles_post_ra>
// kernel: tpu_custom_call.1
= control target key start
LH: loop header
LB: loop body
LE: loop exit
PB: predicated region body
PF: predicated region fallthrough
CT: control target
= control target key end

     0   :  { %12 = vsyncpa [#allocation4], 0  ;;  %s1798_s0 = inlined_call_operand.hbm [shape: f32[16,128], index: 0, kind: input, shape index: {}]   ;;  %s1799_s1 = inlined_call_operand.hbm [shape: bf16[128,128], index: 1, kind: input, shape index: {}]   ;;  %s1800_s2 = inlined_call_operand.vmem [shape: f32[1,128], index: 2, kind: input, shape index: {}]   ;;  %s1801_s3 = inlined_call_operand.vmem [shape: f32[1,128], index: 3, kind: input, shape index: {}]   ;;  %s1802_s4 = inlined_call_operand.vmem [shape: f32[1,128], index: 4, kind: input, shape index: {}]   ;;  %s1803_s5 = inlined_call_operand.hbm [shape: bf16[128,1536], index: 5, kind: input, shape index: {}]   ;;  %s1804_s6 = inlined_call_operand.vmem [shape: f32[1,1536], index: 6, kind: input, shape index: {}]   ;;  %s1805_s7 = inlined_call_operand.hbm [shape: f32[16,1536], index: 7, kind: output, shape index: {}]  }
   0x1   :  { %13 = vsyncpa [#allocation7], 0 }
   0x2   :  { %14 = vsyncpa [#allocation5], 0 }
   0x3   :  { %16 = vsyncpa [#allocation5 + $0x1], 0  ;;  %s1472_s24 = smov 0   ;;  %s1474_s25 = smov 0  }
   0x4   :  { %s1476_s26 = smov 0   ;;  %s1478_s27 = smov 0  }
   0x5   :  { %s1480_s28 = smov 0   ;;  %s1482_s29 = smov 0  }
   0x6 LB: > { %1813 = sst [smem:[#allocation14_spill]] %s1393_s24  ;;  %s1503_s30 = sadd.s32 4294967295, %s1413_s29   ;;  %s1413_s29 = sphi %s1482_s29, %s22_s29   ;;  %s1409_s28 = sphi %s1480_s28, %s1838_s28   ;;  %s1405_s27 = sphi %s1478_s27, %s1837_s27   ;;  %s1401_s26 = sphi %s1476_s26, %s1836_s26   ;;  %s1397_s25 = sphi %s1474_s25, %s1835_s25   ;;  %s1393_s24 = sphi %s1472_s24, %s1834_s24  }
   0x7   : > { %s983_s8 = sadd.s32 4294967294, %s1413_s29   ;;  %p158_p0 = scmp.ne.s32.totalorder %s1401_s26, %s1397_s25 }
   0x8   : > { %p159_p1 = scmp.eq.s32.totalorder %s1413_s29, 0  ;;  %p164_p2 = scmp.ne.s32.totalorder %s1397_s25, %s1393_s24 }
   0x9   : > { %p1806_p3 = scmp.eq.s32.totalorder %s1503_s30, 0  ;;  %p216_p4 = scmp.eq.s32.totalorder %s1503_s30, 2 }
   0xa   : > { %p1514_p5 = por %p159_p1, %p158_p0  ;;  %p222_p6 = scmp.eq.s32.totalorder %s983_s8, 2 }
   0xb   : > { %p1520_p7 = por %p1806_p3, %p164_p2  ;;  %p1524_p8 = por %p216_p4, %p158_p0 }
   0xc   : > { %p1528_p9 = por %p222_p6, %p164_p2  ;;  %p984_p10 = scmp.ge.s32.totalorder %s1413_s29, 1 }
   0xd   : > { %s1815_s11 = scalar_select %p1520_p7, 1, 0 }
   0xe   : > { %s1816_s12 = scalar_select %p1524_p8, 1, 0 }
   0xf   : > { %s1818_s13 = scalar_select %p1528_p9, 1, 0 }
  0x10   : > { %1817 = sst [smem:[#allocation15_spill]] %s1816_s12  ;;  %p229_p11 = scmp.lt.s32.totalorder %s1413_s29, 4 }
  0x11   : > { %1819 = sst [smem:[#allocation16_spill]] %s1818_s13  ;;  %s1415_s15 = smov [#allocation3]  }
  0x12   : > { %p1534_p12 = pnand %p984_p10, %p229_p11  ;;  %s244_s16 = sshll.u32 %s1415_s15, 4  ;;  %s1538_s16 = int_to_ptr.vmem [resolvable:$true] %s244_s16 }
  0x13   : > { %p1106_p0 = scmp.lt.s32.totalorder %s1413_s29, 3  ;;  %s1416_s18 = smov [#allocation6]  }
  0x14   : > { %p1089_p13 = pneg %p1534_p12  ;;  %s257_s19 = sshll.u32 %s1416_s18, 4  ;;  %s1555_s19 = int_to_ptr.vmem [resolvable:$true] %s257_s19 }
  0x15   : > { %p1551_p2 = pnand %p1106_p0, %p1514_p5  ;;  %s1237_s23 = scalar_lea.hbm %s1798_s0, 256 }
  0x16   : > { %p1545_p1 = pnand %p1089_p13, %p1806_p3  ;;  %p1238_p4 = scmp.ne.s32.totalorder %s1798_s0, %s1237_s23 }
  0x17   : > { %p1244_p5 = scmp.lt.u32.totalorder %s1237_s23, %s1798_s0 }
  0x18   : > { %p1239_p6 = pneg %p1545_p1 }
  0x1a   : > { %p1240_p10 = pnand %p1239_p6, %p1238_p4 }
  0x1c   : > { %p1241_p11 = pneg %p1240_p10 }
  0x1e   : > { %p1246_p13 = pnand %p1244_p5, %p1241_p11 }
  0x20   : > { %1249 = shalt.err (!%p1246_p13)
}
  0x21   : > { %s1250_s21 = scalar_lea.vmem %s1538_s16, 256  ;;  %p1258_p8 = scmp.lt.s32.totalorder %s1538_s16, %s1538_s16 }
  0x22   : > { %p1251_p0 = scmp.ne.s32.totalorder %s1538_s16, %s1250_s21  ;;  %p1259_p4 = scmp.lt.s32.totalorder %s1250_s21, %s1250_s21 }
  0x24   : > { %p1253_p3 = pnand %p1251_p0, %p1239_p6  ;;  %p1260_p10 = por %p1259_p4, %p1258_p8 }
  0x26   : > { %p1254_p9 = pneg %p1253_p3 }
  0x28   : > { %p1261_p7 = pnand %p1260_p10, %p1254_p9 }
  0x2a   : > { %1264 = shalt.err (!%p1261_p7)
}
  0x2b   : > { %s1417_s22 = smov 128   ;;  %s1418_s23 = smov 8  }
  0x2c   : > { %1092 = dma.hbm_to_vmem [thread:$0]  (!%p1545_p1), %s1798_s0, 256, %s1538_s16, [#allocation4], %s1417_s22, %s1417_s22, %s1418_s23  }
  0x2d   : > { %s1265_s9 = scalar_lea.hbm %s1799_s1, 1024 }
  0x2e   : > { %p1266_p3 = scmp.ne.s32.totalorder %s1799_s1, %s1265_s9  ;;  %p1272_p9 = scmp.lt.u32.totalorder %s1265_s9, %s1799_s1 }
  0x30   : > { %p1268_p7 = pnand %p1266_p3, %p1239_p6 }
  0x32   : > { %p1269_p8 = pneg %p1268_p7 }
  0x34   : > { %p1274_p11 = pnand %p1272_p9, %p1269_p8 }
  0x36   : > { %1277 = shalt.err (!%p1274_p11)
}
  0x37   : > { %s1278_s16 = scalar_lea.vmem %s1555_s19, 1024  ;;  %p1286_p4 = scmp.lt.s32.totalorder %s1555_s19, %s1555_s19 }
  0x38   : > { %p1279_p5 = scmp.ne.s32.totalorder %s1555_s19, %s1278_s16  ;;  %p1287_p10 = scmp.lt.s32.totalorder %s1278_s16, %s1278_s16 }
  0x3a   : > { %p1281_p13 = pnand %p1279_p5, %p1239_p6  ;;  %p1288_p3 = por %p1287_p10, %p1286_p4 }
  0x3c   : > { %p1282_p0 = pneg %p1281_p13 }
  0x3e   : > { %p1289_p7 = pnand %p1288_p3, %p1282_p0 }
  0x40   : > { %1292 = shalt.err (!%p1289_p7)
}
  0x41   : > { %s1419_s24 = smov 64   ;;  %s1420_s9 = smov 4  }
  0x42   : > { %1095 = dma.hbm_to_vmem [thread:$0]  (!%p1545_p1), %s1799_s1, 1024, %s1555_s19, [#allocation7], %s1419_s24, %s1419_s24, %s1420_s9  }
  0x43   : > { %s280_s22 = sand.u32 1, %s1413_s29   ;;  %s31_s23 = sadd.s32 1, %s1409_s28 }
  0x44   : > { %s282_s8 = sand.u32 1, %s1401_s26   ;;  %p32_p6 = scmp.ge.s32.totalorder %s31_s23, 3 }
  0x45   : > { %s988_s15 = sshll.u32 %s282_s8, 8  ;;  %s1046_s10 = sshll.u32 %s1409_s28, 8 }
  0x46   : > { %s1840_s23 = smov (%p32_p6, %s31_s23), 0  ;;  %s1618_s16 = scalar_lea.hbm %s1803_s5, %s1046_s10 }
  0x47   : > { %s284_s17 = scalar_lea.vmem [#allocation8], %s988_s15  ;;  %s148_s24 = ssub.s32 %s1409_s28, %s1840_s23 }
  0x48   : > { %s291_s19 = sshll.u32 %s284_s17, 4  ;;  %p149_p1 = scmp.eq.s32.totalorder %s148_s24, 0  ;;  %s1622_s19 = int_to_ptr.vmem [resolvable:$true] %s291_s19 }
  0x49   : > { %s1823_s9 = sadd.s32 1, %s1401_s26  ;;  %s1629_s13 = scalar_lea.sflag [#allocation4], %s280_s22 }
  0x4a   : > { %s1627_s12 = scalar_select %p149_p1, %s1401_s26, %s1823_s9  }
  0x4b   : > { %s1293_s8 = scalar_lea.hbm %s1618_s16, 4096  ;;  %p1295_p9 = pneg %p1551_p2 }
  0x4c   : > { %p1294_p8 = scmp.ne.s32.totalorder %s1618_s16, %s1293_s8  ;;  %s1298_s18 = scalar_lea.hbm %s1803_s5, 12288 }
  0x4d   : > { %p1299_p13 = scmp.lt.u32.totalorder %s1618_s16, %s1803_s5  ;;  %p1300_p0 = scmp.lt.u32.totalorder %s1298_s18, %s1293_s8 }
  0x4e   : > { %p1296_p11 = pnand %p1295_p9, %p1294_p8  ;;  %p1302_p10 = scmp.lt.u32.totalorder %s1293_s8, %s1618_s16 }
  0x4f   : > { %p1301_p4 = por %p1300_p0, %p1299_p13 }
  0x50   : > { %p1297_p5 = pneg %p1296_p11 }
  0x51   : > { %p1303_p3 = por %p1302_p10, %p1301_p4 }
  0x53   : > { %p1304_p7 = pnand %p1303_p3, %p1297_p5 }
  0x55   : > { %1307 = shalt.err (!%p1304_p7)
}
  0x56   : > { %s1308_s22 = scalar_lea.vmem %s1622_s19, 4096  ;;  %s1421_s24 = smov [#allocation8]  }
  0x57   : > { %p1309_p6 = scmp.ne.s32.totalorder %s1622_s19, %s1308_s22  ;;  %s1313_s9 = sshll.u32 %s1421_s24, 4  ;;  %s1314_s9 = int_to_ptr.vmem [resolvable:$false] %s1313_s9 }
  0x58   : > { %s1315_s15 = scalar_lea.vmem %s1314_s9, 8192  ;;  %p1316_p11 = scmp.lt.s32.totalorder %s1622_s19, %s1314_s9 }
  0x59   : > { %p1311_p1 = pnand %p1309_p6, %p1295_p9  ;;  %p1317_p13 = scmp.lt.s32.totalorder %s1315_s15, %s1308_s22 }
  0x5b   : > { %p1312_p8 = pneg %p1311_p1  ;;  %p1318_p0 = por %p1317_p13, %p1316_p11 }
  0x5d   : > { %p1319_p4 = pnand %p1318_p0, %p1312_p8 }
  0x5f   : > { %1322 = shalt.err (!%p1319_p4)
}
  0x60   : > { %s1422_s8 = smov 768   ;;  %s1423_s10 = smov 256  }
  0x61   : > { %s1424_s18 = smov 16   ;;  %311 = sbr.rel (%p1534_p12) target bundleno = 966 (0x3c6), region = 48 }
  0x62   : > { %1099 = dma.hbm_to_vmem [thread:$0]  (!%p1551_p2), %s1618_s16, 4096, %s1622_s19, %s1629_s13, %s1422_s8, %s1423_s10, %s1424_s18  }
  0x63   : > { %p1824_p9 = scmp.eq.s32.totalorder (!%p1534_p12), %s1503_s30, 0 }
  0x68   : > { %1376 = dma.done.wait (%p1824_p9), [#allocation4], 256   ;;  %p1825_p5 = pmov %p1824_p9 }
  0x6a   : > { %1378 = vsyncadd (%p1825_p5), [#allocation4], 4294967040  ;;  %p1826_p10 = pmov %p1825_p5 }
  0x6b   : > { %p1827_p3 = pmov %p1825_p5 }
  0x6c   : > { %1380 = dma.done.wait (%p1826_p10), [#allocation7], 1024  }
  0x6d   : > { %1382 = vsyncadd (%p1827_p3), [#allocation7], 4294966272  ;;  %s321_s20 = sand.u32 1, %s1503_s30   ;;  %s1669_s16 = sand.u32 1, %s1397_s25  }
  0x6e   : > { %s994_s14 = sshll.u32 %s1669_s16, 8  ;;  %s322_s19 = scalar_lea.sflag [#allocation4], %s321_s20 }
  0x6f   : > { %s1672_s13 = scalar_lea.vmem [#allocation8], %s994_s14  ;;  %p1828_p12 = scmp.ne.s32.totalorder %s1815_s11, 0 }
  0x71   : > { %1384 = dma.done.wait (%p1828_p12), %s322_s19, 4096  }
  0x72   : > { %1386 = vsyncadd (%p1828_p12), %s322_s19, 4294963200  ;;  %s995_s21 = sshll.u32 %s1669_s16, 6  ;;  %s996_s17 = sshll.u32 %s1405_s27, 2 }
  0x73   : > { %p363_p2 = scmp.lt.s32.totalorder %s996_s17, 11  ;;  %s1686_s9 = scalar_lea.vmem [#allocation9], %s995_s21 }
  0x74   : > { %p997_p7 = scmp.ne.s32.totalorder %s1405_s27, 0 }
  0x75   : > { %s1842_s17 = smov (!%p363_p2, %s996_s17), 11  ;;  %v1173_v0 = vld [vmem:[#allocation6] sm:$0xff] (!%p997_p7)   ;;  %v1425_v1 = vmov (!%p997_p7), 0.0   ;;  %v1174_v2 = vld [vmem:[#allocation6 + $0x8] sm:$0xff] (!%p997_p7)   ;;  %vm1426_vm0 = vmmov (!%p997_p7), 0   ;;  %v1175_v3 = vld [vmem:[#allocation6 + $0x10] sm:$0xff] (!%p997_p7)  }
  0x76   : > { %s365_s24 = scalar_lea.vmem %s1804_s6, %s1842_s17  ;;  %373 = sbr.rel (%p997_p7) target bundleno = 699 (0x2bb), region = 64  ;;  %1057 = vmatprep.subr.bf16.mxu0 (!%p997_p7), %v1425_v1  ;;  %1073 = vmatprep.mubr.msk.bf16.mxu0 (!%p997_p7), %vm1426_vm0, %v1425_v1  ;;  %v1176_v4 = vld [vmem:[#allocation6 + $0x18] sm:$0xff] (!%p997_p7)   ;;  %v1177_v5 = vld [vmem:[#allocation6 + $0x20] sm:$0xff] (!%p997_p7)   ;;  %v1178_v6 = vld [vmem:[#allocation6 + $0x28] sm:$0xff] (!%p997_p7)  }
  0x77   : > { %1058 = vmatpush3.bf16.msra.mxu0 (!%p997_p7), %v1173_v0  ;;  %v1179_v7 = vld [vmem:[#allocation6 + $0x30] sm:$0xff] (!%p997_p7)   ;;  %v1180_v8 = vld [vmem:[#allocation6 + $0x38] sm:$0xff] (!%p997_p7)   ;;  %v998_v12 = vld [vmem:[%s1800_s2] ss:$0 sm:$0xff] (!%p997_p7) }
  0x78   : > { %1059 = vmatprep.subr.bf16.mxu0 (!%p997_p7), %v1425_v1  ;;  %v374_v9 = vld [vmem:[#allocation3] sm:$0xff] (!%p997_p7)  ;;  %v375_v10 = vld [vmem:[#allocation3 + $0x8] sm:$0xff] (!%p997_p7)  ;;  %v1007_v45 = vld [vmem:[%s1801_s3] ss:$0 sm:$0xff] (!%p997_p7) }
  0x79   : > { %v376_v11 = vpack.c.bf16 (!%p997_p7), %v375_v10, %v374_v9  ;;  %v1008_v49 = vld [vmem:[%s1802_s4] ss:$0 sm:$0xff] (!%p997_p7) }
  0x7b   : > { %1060 = vmatpush3.bf16.msra.mxu0 (!%p997_p7), %v1174_v2 }
  0x7c   : > { %1061 = vmatprep.subr.bf16.mxu0 (!%p997_p7), %v1425_v1 }
  0x7f   : > { %1062 = vmatpush3.bf16.msra.mxu0 %v1175_v3 }
  0x80   : > { %1063 = vmatprep.subr.bf16.mxu0 %v1425_v1 }
  0x83   : > { %1064 = vmatpush3.bf16.msra.mxu0 %v1176_v4 }
  0x84   : > { %1065 = vmatprep.subr.bf16.mxu0 %v1425_v1 }
  0x87   : > { %1066 = vmatpush3.bf16.msra.mxu0 %v1177_v5 }
  0x88   : > { %1067 = vmatprep.subr.bf16.mxu0 %v1425_v1 }
  0x8b   : > { %1068 = vmatpush3.bf16.msra.mxu0 %v1178_v6 }
  0x8c   : > { %1069 = vmatprep.subr.bf16.mxu0 %v1425_v1 }
  0x8f   : > { %1070 = vmatpush3.bf16.msra.mxu0 %v1179_v7 }
  0x90   : > { %1071 = vmatprep.subr.bf16.mxu0 %v1425_v1 }
  0x93   : > { %1072 = vmatpush3.bf16.msra.mxu0 %v1180_v8 }
  0x96   : > { %1074 = vmatmul.mubr.bf16.vlgmr.msra.gmra.mrb[0].mxu0 %v376_v11 }
 0x169   : > { %v482_v13 = vpop.f32.mrb[0].mxu0 }
 0x16a   : > { %v483_v14 = vadd.f32 %v998_v12, %v482_v13  ;;  %v1075_v15 = vpop.f32.mrb[1].mxu0 }
 0x16b   : > { %v485_v16 = vpop.f32.mrb[2].mxu0 }
 0x16c   : > { %v491_v17 = vmul.f32 0.70710677, %v483_v14  ;;  %v486_v18 = vadd.f32 %v998_v12, %v485_v16  ;;  %v1076_v19 = vpop.f32.mrb[3].mxu0  ;;  %v489_v22 = vmul.f32 0.5, %v483_v14 }
 0x16e   : > { %1181 = verf.f32 %v491_v17  ;;  %v492_v20 = vmul.f32 0.70710677, %v486_v18  ;;  %v490_v27 = vmul.f32 0.5, %v486_v18 }
 0x170   : > { %1183 = verf.f32 %v492_v20 }
 0x178   : > { %v1182_v21 = vpop.eup %1181 }
 0x179   : > { %v495_v23 = vadd.f32 1.0, %v1182_v21 }
 0x17a   : > { %v1184_v24 = vpop.eup %1183 }
 0x17b   : > { %v497_v25 = vmul.f32 %v495_v23, %v489_v22  ;;  %v496_v26 = vadd.f32 1.0, %v1184_v24 }
 0x17d   : > { %499 = vadd.xlane.f32.xlu0 %v497_v25  ;;  %v498_v28 = vmul.f32 %v496_v26, %v490_v27 }
 0x181   : > { %501 = vadd.xlane.f32.xlu0 %v498_v28 }
 0x20a   : > { %v500_v29 = vpop.xlane.xlu0 %499 }
 0x20b   : > { %v504_v30 = vmul.f32 0.0078125, %v500_v29 }
 0x20d   : > { %v506_v31 = vsub.f32 %v497_v25, %v504_v30 }
 0x20e   : > { %v502_v32 = vpop.xlane.xlu0 %501 }
 0x20f   : > { %v505_v33 = vmul.f32 0.0078125, %v502_v32  ;;  %v508_v34 = vmul.f32 %v506_v31, %v506_v31 }
 0x211   : > { %v507_v35 = vsub.f32 %v498_v28, %v505_v33  ;;  %510 = vadd.xlane.f32.xlu1 %v508_v34 }
 0x213   : > { %v509_v36 = vmul.f32 %v507_v35, %v507_v35 }
 0x215   : > { %512 = vadd.xlane.f32.xlu1 %v509_v36 }
 0x29e   : > { %v511_v37 = vpop.xlane.xlu1 %510 }
 0x29f   : > { %v514_v38 = vmul.f32 0.0078125, %v511_v37 }
 0x2a1   : > { %v516_v39 = vadd.f32 1e-05, %v514_v38 }
 0x2a2   : > { %v513_v40 = vpop.xlane.xlu1 %512 }
 0x2a3   : > { %1185 = vrsqrt.f32 %v516_v39  ;;  %v515_v41 = vmul.f32 0.0078125, %v513_v40 }
 0x2a5   : > { %v517_v42 = vadd.f32 1e-05, %v515_v41 }
 0x2a7   : > { %1187 = vrsqrt.f32 %v517_v42 }
 0x2ad   : > { %v1186_v43 = vpop.eup %1185 }
 0x2ae   : > { %v520_v44 = vmul.f32 %v1186_v43, %v506_v31 }
 0x2b0   : > { %v529_v47 = vmul.f32 %v1007_v45, %v520_v44 }
 0x2b1   : > { %v1188_v46 = vpop.eup %1187 }
 0x2b2   : > { %v521_v48 = vmul.f32 %v1188_v46, %v507_v35  ;;  %v538_v51 = vadd.f32 %v1008_v49, %v529_v47 }
 0x2b4   : > { %v530_v50 = vmul.f32 %v1007_v45, %v521_v48 }
 0x2b6   : > { %v539_v52 = vadd.f32 %v1008_v49, %v530_v50 }
 0x2b8   : > { %v540_v53 = vpack.c.bf16 %v539_v52, %v538_v51 }
 0x2ba   : > { %541 = vst [vmem:[#allocation2] sm:$0xff] %v540_v53 }
 0x2bb PF: > { %v1189_v54 = vld [vmem:[%s1672_s13 + $0x4] ss:$16 sps:$4 sm:$0xff]   ;;  %v1191_v55 = vld [vmem:[%s1672_s13 + $0xc] ss:$16 sps:$4 sm:$0xff]   ;;  %v1427_v56 = vmov 0   ;;  %v577_v24 = vlaneseq  ;;  %s868_s21 = sshll.u32 %s1686_s9, 4  ;;  %s1744_s21 = int_to_ptr.vmem [resolvable:$true] %s868_s21 }
 0x2bc   : > { %789 = vmatprep.mubr.bf16.mxu0 %v1427_v56  ;;  %832 = vmatprep.mubr.bf16.mxu1 %v1427_v56  ;;  %v1193_v57 = vld [vmem:[%s1672_s13] ss:$16 sps:$4 sm:$0xff]   ;;  %v1194_v58 = vld [vmem:[%s1672_s13 + $0x8] ss:$16 sps:$4 sm:$0xff]   ;;  %v1195_v59 = vld [vmem:[%s1672_s13 + $0x24] ss:$16 sps:$4 sm:$0xff]  }
 0x2bd   : > { %757 = vmatprep.subr.bf16.mxu0 %v1189_v54  ;;  %800 = vmatprep.subr.bf16.mxu1 %v1191_v55  ;;  %v1197_v60 = vld [vmem:[%s1672_s13 + $0x2c] ss:$16 sps:$4 sm:$0xff]   ;;  %v1199_v61 = vld [vmem:[%s1672_s13 + $0x20] ss:$16 sps:$4 sm:$0xff]   ;;  %v1200_v62 = vld [vmem:[%s1672_s13 + $0x28] ss:$16 sps:$4 sm:$0xff]  }
 0x2be   : > { %758 = vmatpush1.bf16.msra.mxu0 %v1193_v57  ;;  %801 = vmatpush1.bf16.msra.mxu1 %v1194_v58  ;;  %v1201_v63 = vld [vmem:[%s1672_s13 + $0x44] ss:$16 sps:$4 sm:$0xff]   ;;  %v1203_v0 = vld [vmem:[%s1672_s13 + $0x4c] ss:$16 sps:$4 sm:$0xff]   ;;  %v1205_v1 = vld [vmem:[%s1672_s13 + $0x40] ss:$16 sps:$4 sm:$0xff]  }
 0x2bf   : > { %759 = vmatprep.subr.bf16.mxu0 %v1195_v59  ;;  %802 = vmatprep.subr.bf16.mxu1 %v1197_v60  ;;  %v1206_v2 = vld [vmem:[%s1672_s13 + $0x48] ss:$16 sps:$4 sm:$0xff]   ;;  %v1207_v3 = vld [vmem:[%s1672_s13 + $0x64] ss:$16 sps:$4 sm:$0xff]   ;;  %v1209_v4 = vld [vmem:[%s1672_s13 + $0x6c] ss:$16 sps:$4 sm:$0xff]  }
 0x2c0   : > { %v1211_v5 = vld [vmem:[%s1672_s13 + $0x60] ss:$16 sps:$4 sm:$0xff]   ;;  %v1212_v6 = vld [vmem:[%s1672_s13 + $0x68] ss:$16 sps:$4 sm:$0xff]   ;;  %v1213_v7 = vld [vmem:[%s1672_s13 + $0x84] ss:$16 sps:$4 sm:$0xff]  }
 0x2c1   : > { %v1215_v8 = vld [vmem:[%s1672_s13 + $0x8c] ss:$16 sps:$4 sm:$0xff]   ;;  %v1217_v9 = vld [vmem:[%s1672_s13 + $0x80] ss:$16 sps:$4 sm:$0xff]   ;;  %v1218_v10 = vld [vmem:[%s1672_s13 + $0x88] ss:$16 sps:$4 sm:$0xff]  }
 0x2c2   : > { %760 = vmatpush1.bf16.msra.mxu0 %v1199_v61  ;;  %803 = vmatpush1.bf16.msra.mxu1 %v1200_v62  ;;  %v1219_v11 = vld [vmem:[%s1672_s13 + $0xa4] ss:$16 sps:$4 sm:$0xff]   ;;  %v1221_v12 = vld [vmem:[%s1672_s13 + $0xac] ss:$16 sps:$4 sm:$0xff]   ;;  %v1223_v13 = vld [vmem:[%s1672_s13 + $0xa0] ss:$16 sps:$4 sm:$0xff]  }
 0x2c3   : > { %761 = vmatprep.subr.bf16.mxu0 %v1201_v63  ;;  %804 = vmatprep.subr.bf16.mxu1 %v1203_v0  ;;  %v1224_v14 = vld [vmem:[%s1672_s13 + $0xa8] ss:$16 sps:$4 sm:$0xff]   ;;  %v1225_v15 = vld [vmem:[%s1672_s13 + $0xc4] ss:$16 sps:$4 sm:$0xff]   ;;  %v1227_v16 = vld [vmem:[%s1672_s13 + $0xcc] ss:$16 sps:$4 sm:$0xff]  }
 0x2c4   : > { %v1229_v17 = vld [vmem:[%s1672_s13 + $0xc0] ss:$16 sps:$4 sm:$0xff]   ;;  %v1230_v18 = vld [vmem:[%s1672_s13 + $0xc8] ss:$16 sps:$4 sm:$0xff]   ;;  %v1231_v19 = vld [vmem:[%s1672_s13 + $0xe4] ss:$16 sps:$4 sm:$0xff]  }
 0x2c5   : > { %v1233_v20 = vld [vmem:[%s1672_s13 + $0xec] ss:$16 sps:$4 sm:$0xff]   ;;  %v1235_v21 = vld [vmem:[%s1672_s13 + $0xe0] ss:$16 sps:$4 sm:$0xff]   ;;  %v1236_v22 = vld [vmem:[%s1672_s13 + $0xe8] ss:$16 sps:$4 sm:$0xff]  }
 0x2c6   : > { %762 = vmatpush1.bf16.msra.mxu0 %v1205_v1  ;;  %805 = vmatpush1.bf16.msra.mxu1 %v1206_v2  ;;  %v542_v23 = vld [vmem:[#allocation2] sm:$0xff]  ;;  %v578_v25 = vshrl.u32 %v577_v24, 7  ;;  %s1047_s13 = sshll.u32 %s1405_s27, 9  ;;  %s1829_s22 = sld [smem:[#allocation15_spill]] }
 0x2c7   : > { %763 = vmatprep.subr.bf16.mxu0 %v1207_v3  ;;  %806 = vmatprep.subr.bf16.mxu1 %v1209_v4  ;;  %v575_v28 = vld [vmem:[%s365_s24] sm:$0xf]  ;;  %s1740_s27 = scalar_lea.hbm %s1805_s7, %s1047_s13  ;;  %s852_s24 = scalar_lea.sflag [#allocation5], %s1669_s16 }
 0x2c8   : > { %v579_v26 = vsub.s32 0, %v578_v25  ;;  %v587_v27 = vsub.s32 2, %v578_v25  ;;  %v583_v29 = vsub.s32 1, %v578_v25  ;;  %v591_v30 = vsub.s32 3, %v578_v25  ;;  %s1323_s11 = scalar_lea.vmem %s1744_s21, 1024  ;;  %s1428_s15 = smov [#allocation9]  }
 0x2c9   : > { %p1324_p6 = scmp.ne.s32.totalorder %s1744_s21, %s1323_s11  ;;  %s1327_s8 = sshll.u32 %s1428_s15, 4  ;;  %s1328_s8 = int_to_ptr.vmem [resolvable:$false] %s1327_s8 }
 0x2ca   : > { %764 = vmatpush1.bf16.msra.mxu0 %v1211_v5  ;;  %807 = vmatpush1.bf16.msra.mxu1 %v1212_v6  ;;  %v580_v31 = vrot.slane %v575_v28, %v579_v26  ;;  %v588_v32 = vrot.slane %v575_v28, %v587_v27  ;;  %v584_v33 = vrot.slane %v575_v28, %v583_v29  ;;  %s1329_s10 = scalar_lea.vmem %s1328_s8, 2048  ;;  %p1330_p13 = scmp.lt.s32.totalorder %s1744_s21, %s1328_s8 }
 0x2cb   : > { %765 = vmatprep.subr.bf16.mxu0 %v1213_v7  ;;  %808 = vmatprep.subr.bf16.mxu1 %v1215_v8  ;;  %v592_v34 = vrot.slane %v575_v28, %v591_v30  ;;  %p1331_p0 = scmp.lt.s32.totalorder %s1329_s10, %s1323_s11 }
 0x2cc   : > { %p1830_p1 = scmp.ne.s32.totalorder %s1829_s22, 0 }
 0x2cd   : > { %p1332_p4 = por %p1331_p0, %p1330_p13 }
 0x2ce   : > { %766 = vmatpush1.bf16.msra.mxu0 %v1217_v9  ;;  %809 = vmatpush1.bf16.msra.mxu1 %v1218_v10  ;;  %p1325_p8 = pnand %p1324_p6, %p1830_p1 }
 0x2cf   : > { %767 = vmatprep.subr.bf16.mxu0 %v1219_v11  ;;  %810 = vmatprep.subr.bf16.mxu1 %v1221_v12 }
 0x2d0   : > { %p1326_p11 = pneg %p1325_p8 }
 0x2d2   : > { %768 = vmatpush1.bf16.msra.mxu0 %v1223_v13  ;;  %811 = vmatpush1.bf16.msra.mxu1 %v1224_v14  ;;  %p1333_p9 = pnand %p1332_p4, %p1326_p11 }
 0x2d3   : > { %769 = vmatprep.subr.bf16.mxu0 %v1225_v15  ;;  %812 = vmatprep.subr.bf16.mxu1 %v1227_v16 }
 0x2d6   : > { %770 = vmatpush1.bf16.msra.mxu0 %v1229_v17  ;;  %813 = vmatpush1.bf16.msra.mxu1 %v1230_v18 }
 0x2d7   : > { %771 = vmatprep.subr.bf16.mxu0 %v1231_v19  ;;  %814 = vmatprep.subr.bf16.mxu1 %v1233_v20 }
 0x2da   : > { %772 = vmatpush1.bf16.msra.mxu0 %v1235_v21  ;;  %815 = vmatpush1.bf16.msra.mxu1 %v1236_v22 }
 0x2dd   : > { %790 = vmatmul.mubr.bf16.vlgmr.msra.gmra.mrb[0].mxu0 %v542_v23  ;;  %833 = vmatmul.mubr.bf16.vlgmr.msra.gmra.mrb[0].mxu1 %v542_v23 }
 0x3b0   : > { %v791_v35 = vpop.f32.mrb[0].mxu0  ;;  %v834_v36 = vpop.f32.mrb[0].mxu1 }
 0x3b1   : > { %v792_v37 = vadd.f32 %v791_v35, %v580_v31  ;;  %v835_v38 = vadd.f32 %v834_v36, %v588_v32  ;;  %v793_v39 = vpop.f32.mrb[1].mxu0  ;;  %v836_v40 = vpop.f32.mrb[1].mxu1 }
 0x3b2   : > { %v794_v41 = vadd.f32 %v793_v39, %v584_v33  ;;  %v837_v42 = vadd.f32 %v836_v40, %v592_v34  ;;  %v795_v43 = vpop.f32.mrb[2].mxu0  ;;  %v838_v44 = vpop.f32.mrb[2].mxu1 }
 0x3b3   : > { %843 = vst [vmem:[%s1686_s9] sm:$0xff] %v792_v37  ;;  %845 = vst [vmem:[%s1686_s9 + $0x10] sm:$0xff] %v835_v38  ;;  %v796_v45 = vadd.f32 %v795_v43, %v580_v31  ;;  %v839_v46 = vadd.f32 %v838_v44, %v588_v32  ;;  %v797_v47 = vpop.f32.mrb[3].mxu0  ;;  %v840_v48 = vpop.f32.mrb[3].mxu1 }
 0x3b4   : > { %844 = vst [vmem:[%s1686_s9 + $0x8] sm:$0xff] %v794_v41  ;;  %846 = vst [vmem:[%s1686_s9 + $0x18] sm:$0xff] %v837_v42  ;;  %v798_v49 = vadd.f32 %v797_v47, %v584_v33  ;;  %v841_v50 = vadd.f32 %v840_v48, %v592_v34 }
 0x3b5   : > { %847 = vst [vmem:[%s1686_s9 + $0x20] sm:$0xff] %v796_v45  ;;  %849 = vst [vmem:[%s1686_s9 + $0x30] sm:$0xff] %v839_v46 }
 0x3b6   : > { %848 = vst [vmem:[%s1686_s9 + $0x28] sm:$0xff] %v798_v49  ;;  %850 = vst [vmem:[%s1686_s9 + $0x38] sm:$0xff] %v841_v50 }
 0x3b7   : > { %1336 = shalt.err (!%p1333_p9)
}
 0x3b8   : > { %s1337_s9 = scalar_lea.hbm %s1740_s27, 1024  ;;  %s1341_s14 = scalar_lea.hbm %s1805_s7, 3072 }
 0x3b9   : > { %p1338_p5 = scmp.ne.s32.totalorder %s1740_s27, %s1337_s9  ;;  %p1342_p12 = scmp.lt.u32.totalorder %s1740_s27, %s1805_s7 }
 0x3ba   : > { %p1343_p2 = scmp.lt.u32.totalorder %s1341_s14, %s1337_s9  ;;  %p1345_p6 = scmp.lt.u32.totalorder %s1337_s9, %s1740_s27 }
 0x3bb   : > { %p1339_p10 = pnand %p1338_p5, %p1830_p1 }
 0x3bc   : > { %p1344_p7 = por %p1343_p2, %p1342_p12 }
 0x3bd   : > { %p1340_p3 = pneg %p1339_p10 }
 0x3be   : > { %p1346_p8 = por %p1345_p6, %p1344_p7 }
 0x3c0   : > { %p1347_p11 = pnand %p1346_p8, %p1340_p3 }
 0x3c2   : > { %1350 = shalt.err (!%p1347_p11)
}
 0x3c3   : > { %s1429_s17 = smov 512   ;;  %s1430_s30 = smov 1536  }
 0x3c4   : > { %s1431_s11 = smov 32  }
 0x3c5   : > { %1087 = dma.vmem_to_hbm [thread:$0]  (%p1830_p1), %s1744_s21, 1024, %s1740_s27, %s852_s24, %s1429_s17, %s1430_s30, %s1431_s11  }
 0x3c6 PF: > { %s1831_s15 = sld [smem:[#allocation14_spill]]  ;;  %s1832_s8 = sld [smem:[#allocation16_spill]] }
 0x3c7   : > { %p1109_p13 = scmp.ge.s32.totalorder %s1413_s29, 2 }
 0x3cc   : > { %s883_s10 = sand.u32 1, %s1831_s15   ;;  %p1833_p0 = scmp.ne.s32.totalorder %s1832_s8, 0 }
 0x3cd   : > { %s884_s9 = scalar_lea.sflag [#allocation5], %s883_s10 }
 0x3ce   : > { %p1101_p4 = pnand %p1109_p13, %p1833_p0 }
 0x3d0   : > { %1388 = dma.done.wait (!%p1101_p4), %s884_s9, 1024  }
 0x3d1   : > { %1390 = vsyncadd (!%p1101_p4), %s884_s9, 4294966272  ;;  %s22_s29 = sadd.s32 1, %s1413_s29   ;;  %s1834_s24 = smov %s1397_s25 }
 0x3d2   : > { %p19_p9 = scmp.ge.s32.totalorder %s22_s29, 5   ;;  %s1835_s25 = smov %s1401_s26 }
 0x3d3   : > { %s1836_s26 = smov %s1627_s12  ;;  %s1837_s27 = smov %s1409_s28 }
 0x3d4   : > { %s1838_s28 = smov %s1840_s23  ;;  %21 = sbr.rel (!%p19_p9) target bundleno = 6 (0x6), region = 108 }
 0x3db   :  { %889 = vsyncpa [#allocation4], 1 }
 0x3dc   :  { %891 = vsyncpa [#allocation4 + $0x1], 1 }
 0x3dd   :  { %892 = vsyncpa [#allocation7], 1 }
 0x3de   :  { %893 = vsyncpa [#allocation5], 1 }
 0x3df   :  { %895 = vsyncpa [#allocation5 + $0x1], 1 }

</bundles_post_ra>
